<compile_context>
chip_gen: v7x
topology: tpu7x:2x2x1
jax: 0.10.0
libtpu: 0.0.40
codegen_flags: <defaults>
</compile_context>

<pallas_src>
import functools

import jax
import jax.numpy as jnp
from jax.experimental import pallas as pl
from jax.experimental.pallas import tpu as pltpu


# Convs with max(C) >= this skip im2col (K = C already fills the MXU contraction).
_IM2COL_MAX_C = 128
# bf16 sublane tile height: pad each tap's channel block so patch stores are
# full-tile (unmasked) stores.
_SUBLANE_BF16 = 16


def _round_up(x, m):
    return (x + m - 1) // m * m


def _resblock_kernel(*refs, W, cin, cout, cpad_in, cpad_out,
                     has_downsample, use_im2col, edge_is_input):
    """Fused ResBlock forward for one batch element (flattened NCHW, lane = H*W)."""
    i = 0
    if edge_is_input:
        edge_ref = refs[i]; i += 1
    else:
        edge_ref = None
    x_ref, w1_ref, b1_ref, w2_ref, b2_ref = refs[i:i + 5]; i += 5
    if has_downsample:
        wd_ref, bd_ref = refs[i:i + 2]; i += 2
    else:
        wd_ref = bd_ref = None
    o_ref = refs[i]
    xp_ref = refs[i + 1]
    patch_ref = refs[i + 2] if use_im2col else None

    HW = x_ref.shape[-1]
    P = W + 1                                   # halo width on each side of the flat axis
    cpad_max = xp_ref.shape[0]

    # ---- row-edge masks: zero taps that read across an image-row boundary ----
    if edge_is_input:
        not_first = edge_ref[0:1, :]            # 0.0 where w == 0
        not_last = edge_ref[1:2, :]             # 0.0 where w == W-1
    else:                                       # W is a power of two -> iota & (W-1)
        col = jax.lax.broadcasted_iota(jnp.int32, (1, HW), 1) & (W - 1)
        not_first = (col != 0).astype(jnp.float32)
        not_last = (col != W - 1).astype(jnp.float32)

    # Zero the halo columns EVERY grid step (scratch persists across steps; do NOT
    # hoist under pl.when(program_id == 0) -- each TensorCore has its own scratch).
    xp_ref[:, 0:P] = jnp.zeros((cpad_max, P), jnp.float32)
    xp_ref[:, P + HW:P + HW + P] = jnp.zeros((cpad_max, P), jnp.float32)

    def load_plane(xf, c, cpad):
        """Write a (c, HW) f32 plane into the haloed scratch; zero the pad rows."""
        xp_ref[0:c, P:P + HW] = xf
        if c < cpad:
            xp_ref[c:cpad, P:P + HW] = jnp.zeros((cpad - c, HW), jnp.float32)

    def tap_slice(t, cpad):
        """Edge-masked shifted (cpad, HW) f32 view of the plane for 3x3 tap t."""
        dy, dx = t // 3 - 1, t % 3 - 1
        start = P + dy * W + dx                 # static offset
        sl = xp_ref[0:cpad, start:start + HW]
        if dx == -1:
            sl = sl * not_first                 # zero the w == 0 column
        elif dx == 1:
            sl = sl * not_last                  # zero the w == W-1 column
        return sl

    # ---- path A: im2col (small C) -> one (Cout, 9*cpad) x (9*cpad, HW) matmul ----
    def build_patches(cpad, relu):
        for t in range(9):
            sl = tap_slice(t, cpad)
            if relu:
                sl = jnp.maximum(sl, 0.0)       # mask multiply / relu in f32 ...
            # ... bf16 cast fused into the tap store; rows are a full bf16 sublane
            # tile (cpad % 16 == 0) so this is an unmasked full-tile store.
            patch_ref[t * cpad:(t + 1) * cpad, :] = sl.astype(jnp.bfloat16)

    def dot_patches(w_ref, b_ref, cpad, relu):
        p = patch_ref[0:9 * cpad, :]
        if relu:                                # ReLU commutes with shift/mask/cast
            p = jnp.maximum(p, 0.0)
        return jnp.dot(w_ref[...], p, preferred_element_type=jnp.float32) + b_ref[...]

    # ---- path B: direct (large C) -> 9 accumulating MXU dots, no patch matrix ----
    def conv_direct(specs, cpad):
        """specs: list of (w_ref, b_ref, apply_relu). Shares each tap-slice load."""
        accs = [None] * len(specs)
        for t in range(9):
            sl = tap_slice(t, cpad)
            sl_b = sl_rb = None
            for s, (w_ref, _, relu) in enumerate(specs):
                if relu:
                    if sl_rb is None:
                        sl_rb = jnp.maximum(sl, 0.0).astype(jnp.bfloat16)
                    op = sl_rb
                else:
                    if sl_b is None:
                        sl_b = sl.astype(jnp.bfloat16)
                    op = sl_b
                d = jnp.dot(w_ref[:, t * cpad:(t + 1) * cpad], op,
                            preferred_element_type=jnp.float32)
                accs[s] = d if accs[s] is None else accs[s] + d
        return [a + b_ref[...] for a, (_, b_ref, _) in zip(accs, specs)]

    # ---------------- plane 1: x -> skip and conv1(relu(x)) ----------------
    x = x_ref[0].astype(jnp.float32)            # (cin, HW)
    load_plane(x, cin, cpad_in)

    if has_downsample:
        if use_im2col:
            build_patches(cpad_in, relu=False)                       # raw-x patches,
            skip = dot_patches(wd_ref, bd_ref, cpad_in, relu=False)  # built once,
            r = dot_patches(w1_ref, b1_ref, cpad_in, relu=True)      # reused by both
        else:
            skip, r = conv_direct([(wd_ref, bd_ref, False),
                                   (w1_ref, b1_ref, True)], cpad_in)
    else:
        skip = x                                # identity shortcut (cin == cout)
        if use_im2col:
            build_patches(cpad_in, relu=True)   # relu fused into the tap stores
            r = dot_patches(w1_ref, b1_ref, cpad_in, relu=False)
        else:
            (r,) = conv_direct([(w1_ref, b1_ref, True)], cpad_in)

    # ---------------- plane 2: conv2(relu(r)) ----------------
    load_plane(jnp.maximum(r, 0.0), cout, cpad_out)
    if use_im2col:
        build_patches(cpad_out, relu=False)
        r = dot_patches(w2_ref, b2_ref, cpad_out, relu=False)
    else:
        (r,) = conv_direct([(w2_ref, b2_ref, False)], cpad_out)

    o_ref[0] = (skip + r).astype(o_ref.dtype)


def _oihw_to_mat(w_oihw, cpad):
    """(Cout, Cin, 3, 3) -> (Cout, 9*cpad) bf16; tap-t column block = rows t of patches."""
    cout, cin = w_oihw.shape[0], w_oihw.shape[1]
    w = jnp.transpose(w_oihw, (0, 2, 3, 1))                 # (Cout, 3, 3, Cin)
    if cpad > cin:
        w = jnp.pad(w, ((0, 0), (0, 0), (0, 0), (0, cpad - cin)))
    return w.reshape(cout, 9 * cpad).astype(jnp.bfloat16)


def resblock_forward(x_nchw, conv1, conv2, downsample):
    """ResBlock.forward.  conv1/conv2/downsample are (w_oihw, b); downsample may be None."""
    N, Cin, H, W = x_nchw.shape
    Cout = conv1[0].shape[0]
    HW = H * W
    has_ds = downsample is not None
    if not has_ds:
        assert Cin == Cout, "identity shortcut requires indim == outdim"

    cpad_in = _round_up(Cin, _SUBLANE_BF16)
    cpad_out = _round_up(Cout, _SUBLANE_BF16)
    cpad_max = max(cpad_in, cpad_out)
    use_im2col = max(Cin, Cout) < _IM2COL_MAX_C
    edge_is_input = (W & (W - 1)) != 0          # only pass masks in for non-pow2 W

    x_flat = x_nchw.reshape(N, Cin, HW)         # free contiguous reshape (no copy)

    w1 = _oihw_to_mat(conv1[0], cpad_in)
    b1 = conv1[1].reshape(Cout, 1).astype(jnp.float32)
    w2 = _oihw_to_mat(conv2[0], cpad_out)
    b2 = conv2[1].reshape(Cout, 1).astype(jnp.float32)

    args, in_specs = [], []
    if edge_is_input:
        col = jnp.arange(HW, dtype=jnp.int32) % W
        edge = jnp.stack([col != 0, col != W - 1], axis=0).astype(jnp.float32)
        args.append(edge)
        in_specs.append(pl.BlockSpec((2, HW), lambda n: (0, 0)))
    args += [x_flat, w1, b1, w2, b2]
    in_specs += [
        pl.BlockSpec((1, Cin, HW), lambda n: (n, 0, 0)),
        pl.BlockSpec((Cout, 9 * cpad_in), lambda n: (0, 0)),
        pl.BlockSpec((Cout, 1), lambda n: (0, 0)),
        pl.BlockSpec((Cout, 9 * cpad_out), lambda n: (0, 0)),
        pl.BlockSpec((Cout, 1), lambda n: (0, 0)),
    ]
    if has_ds:
        wd = _oihw_to_mat(downsample[0], cpad_in)
        bd = downsample[1].reshape(Cout, 1).astype(jnp.float32)
        args += [wd, bd]
        in_specs += [
            pl.BlockSpec((Cout, 9 * cpad_in), lambda n: (0, 0)),
            pl.BlockSpec((Cout, 1), lambda n: (0, 0)),
        ]

    scratch_shapes = [pltpu.VMEM((cpad_max, HW + 2 * (W + 1)), jnp.float32)]  # haloed plane
    if use_im2col:
        scratch_shapes.append(pltpu.VMEM((9 * cpad_max, HW), jnp.bfloat16))   # bf16 patches

    # Conservative explicit per-step VMEM budget (keeps the plan v7x-safe).
    est = (cpad_max * (HW + 2 * (W + 1)) * 4
           + (9 * cpad_max * HW * 2 if use_im2col else 0)
           + 2 * Cin * HW * 4 + 2 * Cout * HW * 4
           + 2 * (2 + int(has_ds)) * Cout * 9 * cpad_max * 2
           + 8 * 8 * 128 * 4)
    vmem_limit = int(min(64 * 1024 * 1024, max(16 * 1024 * 1024, 2 * est)))

    kernel = functools.partial(
        _resblock_kernel, W=W, cin=Cin, cout=Cout, cpad_in=cpad_in,
        cpad_out=cpad_out, has_downsample=has_ds, use_im2col=use_im2col,
        edge_is_input=edge_is_input)

    out_flat = pl.pallas_call(
        kernel,
        out_shape=jax.ShapeDtypeStruct((N, Cout, HW), x_nchw.dtype),
        grid=(N,),
        in_specs=in_specs,
        out_specs=pl.BlockSpec((1, Cout, HW), lambda n: (n, 0, 0)),
        scratch_shapes=scratch_shapes,
        compiler_params=pltpu.CompilerParams(
            dimension_semantics=("parallel",),
            vmem_limit_bytes=vmem_limit),
    )(*args)

    return out_flat.reshape(N, Cout, H, W)      # free contiguous reshape


# ----------------------------- reference (pure JAX) -----------------------------
def _conv_ref(x_nchw, w_oihw, b):
    y = jax.lax.conv_general_dilated(
        x_nchw, w_oihw, window_strides=(1, 1), padding=((1, 1), (1, 1)),
        dimension_numbers=("NCHW", "OIHW", "NCHW"))
    return y + b[None, :, None, None]


def resblock_ref(x, conv1, conv2, downsample):
    r = _conv_ref(jnp.maximum(x, 0.0), *conv1)
    r = _conv_ref(jnp.maximum(r, 0.0), *conv2)
    xs = _conv_ref(x, *downsample) if downsample is not None else x
    return xs + r


# --------------------------------- main ---------------------------------
if __name__ == "__main__":
    key = jax.random.PRNGKey(0)

    def init_conv(kw, kb, cin, cout):
        # deterministic PyTorch-style kaiming-uniform init (fan_in = cin*3*3)
        bound = 1.0 / (cin * 9) ** 0.5
        w = jax.random.uniform(kw, (cout, cin, 3, 3), jnp.float32, -bound, bound)
        b = jax.random.uniform(kb, (cout,), jnp.float32, -bound, bound)
        return w, b

    def run_case(k, N, Cin, Cout, H, W):
        ks = jax.random.split(k, 7)
        x = jax.random.normal(ks[0], (N, Cin, H, W), jnp.float32)
        c1 = init_conv(ks[1], ks[2], Cin, Cout)
        c2 = init_conv(ks[3], ks[4], Cout, Cout)
        ds = init_conv(ks[5], ks[6], Cin, Cout) if Cin != Cout else None
        out = jax.block_until_ready(resblock_forward(x, c1, c2, ds))
        ref = resblock_ref(x, c1, c2, ds)
        assert out.shape == (N, Cout, H, W), out.shape
        # bf16 matmul operands (f32 accumulation) -> loosened tolerance vs f32 ref.
        err = float(jnp.max(jnp.abs(out - ref)))
        assert jnp.allclose(out, ref, atol=5e-2, rtol=5e-2), err

    keys = jax.random.split(key, 4)
    # Case 1: im2col path, downsample shortcut (indim != outdim).
    run_case(keys[0], N=2, Cin=4, Cout=8, H=16, W=16)
    # Case 2: im2col path, identity shortcut.
    run_case(keys[1], N=2, Cin=8, Cout=8, H=16, W=16)
    # Case 3: direct (no-im2col) path, downsample shortcut.
    run_case(keys[2], N=1, Cin=128, Cout=144, H=8, W=8)
    # Case 4: direct (no-im2col) path, identity shortcut.
    run_case(keys[3], N=2, Cin=128, Cout=128, H=8, W=8)

    print("KERNEL_OK")
</pallas_src>

<mosaic_0001>
module attributes {stable_mosaic.version = 11 : i64} {
  func.func @_resblock_kernel(%arg0: i32, %arg1: memref<1x4x256xf32, #tpu.memory_space<vmem>>, %arg2: memref<8x144xbf16, #tpu.memory_space<vmem>>, %arg3: memref<8x1xf32, #tpu.memory_space<vmem>>, %arg4: memref<8x144xbf16, #tpu.memory_space<vmem>>, %arg5: memref<8x1xf32, #tpu.memory_space<vmem>>, %arg6: memref<8x144xbf16, #tpu.memory_space<vmem>>, %arg7: memref<8x1xf32, #tpu.memory_space<vmem>>, %arg8: memref<1x8x256xf32, #tpu.memory_space<vmem>>, %arg9: memref<16x290xf32, #tpu.memory_space<vmem>>, %arg10: memref<144x256xbf16, #tpu.memory_space<vmem>>) attributes {dimension_semantics = [#tpu.dimension_semantics<parallel>], iteration_bounds = array<i64: 2>, scalar_prefetch = 0 : i64, scratch_operands = 2 : i64, tpu.core_type = #tpu.core_type<tc>, window_params = [{transform_indices = @transform_0, window_bounds = array<i64: 1, 4, 256>}, {pipeline_mode = #tpu.pipeline_mode<synchronous>, transform_indices = @transform_1, window_bounds = array<i64: 8, 144>}, {pipeline_mode = #tpu.pipeline_mode<synchronous>, transform_indices = @transform_2, window_bounds = array<i64: 8, 1>}, {pipeline_mode = #tpu.pipeline_mode<synchronous>, transform_indices = @transform_3, window_bounds = array<i64: 8, 144>}, {pipeline_mode = #tpu.pipeline_mode<synchronous>, transform_indices = @transform_4, window_bounds = array<i64: 8, 1>}, {pipeline_mode = #tpu.pipeline_mode<synchronous>, transform_indices = @transform_5, window_bounds = array<i64: 8, 144>}, {pipeline_mode = #tpu.pipeline_mode<synchronous>, transform_indices = @transform_6, window_bounds = array<i64: 8, 1>}, {transform_indices = @transform_7, window_bounds = array<i64: 1, 8, 256>}]} {
    %0 = tpu.iota {dimensions = array<i32: 1>} : vector<1x256xi32>
    %c15_i32 = arith.constant 15 : i32
    %1 = vector.broadcast %c15_i32 : i32 to vector<1x256xi32>
    %2 = arith.andi %0, %1 : vector<1x256xi32>
    %c0_i32 = arith.constant 0 : i32
    %3 = vector.broadcast %c0_i32 : i32 to vector<1x256xi32>
    %4 = arith.cmpi ne, %2, %3 : vector<1x256xi32>
    %5 = arith.extui %4 : vector<1x256xi1> to vector<1x256xi32>
    %6 = arith.sitofp %5 : vector<1x256xi32> to vector<1x256xf32>
    %c15_i32_0 = arith.constant 15 : i32
    %7 = vector.broadcast %c15_i32_0 : i32 to vector<1x256xi32>
    %8 = arith.cmpi ne, %2, %7 : vector<1x256xi32>
    %9 = arith.extui %8 : vector<1x256xi1> to vector<1x256xi32>
    %10 = arith.sitofp %9 : vector<1x256xi32> to vector<1x256xf32>
    %cst = arith.constant 0.000000e+00 : f32
    %11 = vector.broadcast %cst : f32 to vector<16x17xf32>
    %c0 = arith.constant 0 : index
    %c0_1 = arith.constant 0 : index
    %12 = vector.load %arg9[%c0, %c0_1] : memref<16x290xf32, #tpu.memory_space<vmem>>, vector<16x17xf32>
    tpu.vector_store %arg9[%c0, %c0_1], %11 {strides = array<i32>} : memref<16x290xf32, #tpu.memory_space<vmem>>, vector<16x17xf32>,
    %cst_2 = arith.constant 0.000000e+00 : f32
    %13 = vector.broadcast %cst_2 : f32 to vector<16x17xf32>
    %c0_3 = arith.constant 0 : index
    %c273 = arith.constant 273 : index
    %14 = vector.load %arg9[%c0_3, %c273] : memref<16x290xf32, #tpu.memory_space<vmem>>, vector<16x17xf32>
    tpu.vector_store %arg9[%c0_3, %c273], %13 {strides = array<i32>} : memref<16x290xf32, #tpu.memory_space<vmem>>, vector<16x17xf32>,
    %c0_4 = arith.constant 0 : index
    %c0_5 = arith.constant 0 : index
    %c0_6 = arith.constant 0 : index
    %15 = vector.load %arg1[%c0_4, %c0_5, %c0_6] : memref<1x4x256xf32, #tpu.memory_space<vmem>>, vector<1x4x256xf32>
    %16 = vector.shape_cast %15 : vector<1x4x256xf32> to vector<4x256xf32>
    %c0_7 = arith.constant 0 : index
    %c17 = arith.constant 17 : index
    %17 = vector.load %arg9[%c0_7, %c17] : memref<16x290xf32, #tpu.memory_space<vmem>>, vector<4x256xf32>
    tpu.vector_store %arg9[%c0_7, %c17], %16 {strides = array<i32>} : memref<16x290xf32, #tpu.memory_space<vmem>>, vector<4x256xf32>,
    %cst_8 = arith.constant 0.000000e+00 : f32
    %18 = vector.broadcast %cst_8 : f32 to vector<12x256xf32>
    %c4 = arith.constant 4 : index
    %c17_9 = arith.constant 17 : index
    %19 = vector.load %arg9[%c4, %c17_9] : memref<16x290xf32, #tpu.memory_space<vmem>>, vector<12x256xf32>
    tpu.vector_store %arg9[%c4, %c17_9], %18 {strides = array<i32>} : memref<16x290xf32, #tpu.memory_space<vmem>>, vector<12x256xf32>,
    %c0_10 = arith.constant 0 : index
    %c0_11 = arith.constant 0 : index
    %20 = vector.load %arg9[%c0_10, %c0_11] : memref<16x290xf32, #tpu.memory_space<vmem>>, vector<16x256xf32>
    %21 = vector.broadcast %6 : vector<1x256xf32> to vector<16x256xf32>
    %22 = arith.mulf %20, %21 : vector<16x256xf32>
    %23 = arith.truncf %22 : vector<16x256xf32> to vector<16x256xbf16>
    %c0_12 = arith.constant 0 : index
    %c0_13 = arith.constant 0 : index
    %24 = vector.load %arg10[%c0_12, %c0_13] : memref<144x256xbf16, #tpu.memory_space<vmem>>, vector<16x256xbf16>
    tpu.vector_store %arg10[%c0_12, %c0_13], %23 {strides = array<i32>} : memref<144x256xbf16, #tpu.memory_space<vmem>>, vector<16x256xbf16>,
    %c0_14 = arith.constant 0 : index
    %c1 = arith.constant 1 : index
    %25 = vector.load %arg9[%c0_14, %c1] : memref<16x290xf32, #tpu.memory_space<vmem>>, vector<16x256xf32>
    %26 = arith.truncf %25 : vector<16x256xf32> to vector<16x256xbf16>
    %c16 = arith.constant 16 : index
    %c0_15 = arith.constant 0 : index
    %27 = vector.load %arg10[%c16, %c0_15] : memref<144x256xbf16, #tpu.memory_space<vmem>>, vector<16x256xbf16>
    tpu.vector_store %arg10[%c16, %c0_15], %26 {strides = array<i32>} : memref<144x256xbf16, #tpu.memory_space<vmem>>, vector<16x256xbf16>,
    %c0_16 = arith.constant 0 : index
    %c2 = arith.constant 2 : index
    %28 = vector.load %arg9[%c0_16, %c2] : memref<16x290xf32, #tpu.memory_space<vmem>>, vector<16x256xf32>
    %29 = vector.broadcast %10 : vector<1x256xf32> to vector<16x256xf32>
    %30 = arith.mulf %28, %29 : vector<16x256xf32>
    %31 = arith.truncf %30 : vector<16x256xf32> to vector<16x256xbf16>
    %c32 = arith.constant 32 : index
    %c0_17 = arith.constant 0 : index
    %32 = vector.load %arg10[%c32, %c0_17] : memref<144x256xbf16, #tpu.memory_space<vmem>>, vector<16x256xbf16>
    tpu.vector_store %arg10[%c32, %c0_17], %31 {strides = array<i32>} : memref<144x256xbf16, #tpu.memory_space<vmem>>, vector<16x256xbf16>,
    %c0_18 = arith.constant 0 : index
    %c16_19 = arith.constant 16 : index
    %33 = vector.load %arg9[%c0_18, %c16_19] : memref<16x290xf32, #tpu.memory_space<vmem>>, vector<16x256xf32>
    %34 = vector.broadcast %6 : vector<1x256xf32> to vector<16x256xf32>
    %35 = arith.mulf %33, %34 : vector<16x256xf32>
    %36 = arith.truncf %35 : vector<16x256xf32> to vector<16x256xbf16>
    %c48 = arith.constant 48 : index
    %c0_20 = arith.constant 0 : index
    %37 = vector.load %arg10[%c48, %c0_20] : memref<144x256xbf16, #tpu.memory_space<vmem>>, vector<16x256xbf16>
    tpu.vector_store %arg10[%c48, %c0_20], %36 {strides = array<i32>} : memref<144x256xbf16, #tpu.memory_space<vmem>>, vector<16x256xbf16>,
    %c0_21 = arith.constant 0 : index
    %c17_22 = arith.constant 17 : index
    %38 = vector.load %arg9[%c0_21, %c17_22] : memref<16x290xf32, #tpu.memory_space<vmem>>, vector<16x256xf32>
    %39 = arith.truncf %38 : vector<16x256xf32> to vector<16x256xbf16>
    %c64 = arith.constant 64 : index
    %c0_23 = arith.constant 0 : index
    %40 = vector.load %arg10[%c64, %c0_23] : memref<144x256xbf16, #tpu.memory_space<vmem>>, vector<16x256xbf16>
    tpu.vector_store %arg10[%c64, %c0_23], %39 {strides = array<i32>} : memref<144x256xbf16, #tpu.memory_space<vmem>>, vector<16x256xbf16>,
    %c0_24 = arith.constant 0 : index
    %c18 = arith.constant 18 : index
    %41 = vector.load %arg9[%c0_24, %c18] : memref<16x290xf32, #tpu.memory_space<vmem>>, vector<16x256xf32>
    %42 = vector.broadcast %10 : vector<1x256xf32> to vector<16x256xf32>
    %43 = arith.mulf %41, %42 : vector<16x256xf32>
    %44 = arith.truncf %43 : vector<16x256xf32> to vector<16x256xbf16>
    %c80 = arith.constant 80 : index
    %c0_25 = arith.constant 0 : index
    %45 = vector.load %arg10[%c80, %c0_25] : memref<144x256xbf16, #tpu.memory_space<vmem>>, vector<16x256xbf16>
    tpu.vector_store %arg10[%c80, %c0_25], %44 {strides = array<i32>} : memref<144x256xbf16, #tpu.memory_space<vmem>>, vector<16x256xbf16>,
    %c0_26 = arith.constant 0 : index
    %c32_27 = arith.constant 32 : index
    %46 = vector.load %arg9[%c0_26, %c32_27] : memref<16x290xf32, #tpu.memory_space<vmem>>, vector<16x256xf32>
    %47 = vector.broadcast %6 : vector<1x256xf32> to vector<16x256xf32>
    %48 = arith.mulf %46, %47 : vector<16x256xf32>
    %49 = arith.truncf %48 : vector<16x256xf32> to vector<16x256xbf16>
    %c96 = arith.constant 96 : index
    %c0_28 = arith.constant 0 : index
    %50 = vector.load %arg10[%c96, %c0_28] : memref<144x256xbf16, #tpu.memory_space<vmem>>, vector<16x256xbf16>
    tpu.vector_store %arg10[%c96, %c0_28], %49 {strides = array<i32>} : memref<144x256xbf16, #tpu.memory_space<vmem>>, vector<16x256xbf16>,
    %c0_29 = arith.constant 0 : index
    %c33 = arith.constant 33 : index
    %51 = vector.load %arg9[%c0_29, %c33] : memref<16x290xf32, #tpu.memory_space<vmem>>, vector<16x256xf32>
    %52 = arith.truncf %51 : vector<16x256xf32> to vector<16x256xbf16>
    %c112 = arith.constant 112 : index
    %c0_30 = arith.constant 0 : index
    %53 = vector.load %arg10[%c112, %c0_30] : memref<144x256xbf16, #tpu.memory_space<vmem>>, vector<16x256xbf16>
    tpu.vector_store %arg10[%c112, %c0_30], %52 {strides = array<i32>} : memref<144x256xbf16, #tpu.memory_space<vmem>>, vector<16x256xbf16>,
    %c0_31 = arith.constant 0 : index
    %c34 = arith.constant 34 : index
    %54 = vector.load %arg9[%c0_31, %c34] : memref<16x290xf32, #tpu.memory_space<vmem>>, vector<16x256xf32>
    %55 = vector.broadcast %10 : vector<1x256xf32> to vector<16x256xf32>
    %56 = arith.mulf %54, %55 : vector<16x256xf32>
    %57 = arith.truncf %56 : vector<16x256xf32> to vector<16x256xbf16>
    %c128 = arith.constant 128 : index
    %c0_32 = arith.constant 0 : index
    %58 = vector.load %arg10[%c128, %c0_32] : memref<144x256xbf16, #tpu.memory_space<vmem>>, vector<16x256xbf16>
    tpu.vector_store %arg10[%c128, %c0_32], %57 {strides = array<i32>} : memref<144x256xbf16, #tpu.memory_space<vmem>>, vector<16x256xbf16>,
    %c0_33 = arith.constant 0 : index
    %c0_34 = arith.constant 0 : index
    %59 = vector.load %arg10[%c0_33, %c0_34] : memref<144x256xbf16, #tpu.memory_space<vmem>>, vector<144x256xbf16>
    %c0_35 = arith.constant 0 : index
    %c0_36 = arith.constant 0 : index
    %60 = vector.load %arg6[%c0_35, %c0_36] : memref<8x144xbf16, #tpu.memory_space<vmem>>, vector<8x144xbf16>
    %cst_37 = arith.constant dense<0.000000e+00> : vector<8x256xf32>
    %61 = tpu.matmul %60, %59, %cst_37 {dimension_numbers = #tpu.dot_dimension_numbers<[1], [0], [0], [1], [0, 0, 1, 1], [], []>} : vector<8x144xbf16>, vector<144x256xbf16>, vector<8x256xf32> -> vector<8x256xf32>
    %c0_38 = arith.constant 0 : index
    %c0_39 = arith.constant 0 : index
    %62 = vector.load %arg7[%c0_38, %c0_39] : memref<8x1xf32, #tpu.memory_space<vmem>>, vector<8x1xf32>
    %63 = vector.broadcast %62 : vector<8x1xf32> to vector<8x256xf32>
    %64 = arith.addf %61, %63 : vector<8x256xf32>
    %c0_40 = arith.constant 0 : index
    %c0_41 = arith.constant 0 : index
    %65 = vector.load %arg10[%c0_40, %c0_41] : memref<144x256xbf16, #tpu.memory_space<vmem>>, vector<144x256xbf16>
    %cst_42 = arith.constant 0.000000e+00 : bf16
    %66 = vector.broadcast %cst_42 : bf16 to vector<144x256xbf16>
    %67 = arith.maximumf %65, %66 : vector<144x256xbf16>
    %c0_43 = arith.constant 0 : index
    %c0_44 = arith.constant 0 : index
    %68 = vector.load %arg2[%c0_43, %c0_44] : memref<8x144xbf16, #tpu.memory_space<vmem>>, vector<8x144xbf16>
    %cst_45 = arith.constant dense<0.000000e+00> : vector<8x256xf32>
    %69 = tpu.matmul %68, %67, %cst_45 {dimension_numbers = #tpu.dot_dimension_numbers<[1], [0], [0], [1], [0, 0, 1, 1], [], []>} : vector<8x144xbf16>, vector<144x256xbf16>, vector<8x256xf32> -> vector<8x256xf32>
    %c0_46 = arith.constant 0 : index
    %c0_47 = arith.constant 0 : index
    %70 = vector.load %arg3[%c0_46, %c0_47] : memref<8x1xf32, #tpu.memory_space<vmem>>, vector<8x1xf32>
    %71 = vector.broadcast %70 : vector<8x1xf32> to vector<8x256xf32>
    %72 = arith.addf %69, %71 : vector<8x256xf32>
    %cst_48 = arith.constant 0.000000e+00 : f32
    %73 = vector.broadcast %cst_48 : f32 to vector<8x256xf32>
    %74 = arith.maximumf %72, %73 : vector<8x256xf32>
    %c0_49 = arith.constant 0 : index
    %c17_50 = arith.constant 17 : index
    %75 = vector.load %arg9[%c0_49, %c17_50] : memref<16x290xf32, #tpu.memory_space<vmem>>, vector<8x256xf32>
    tpu.vector_store %arg9[%c0_49, %c17_50], %74 {strides = array<i32>} : memref<16x290xf32, #tpu.memory_space<vmem>>, vector<8x256xf32>,
    %cst_51 = arith.constant 0.000000e+00 : f32
    %76 = vector.broadcast %cst_51 : f32 to vector<8x256xf32>
    %c8 = arith.constant 8 : index
    %c17_52 = arith.constant 17 : index
    %77 = vector.load %arg9[%c8, %c17_52] : memref<16x290xf32, #tpu.memory_space<vmem>>, vector<8x256xf32>
    tpu.vector_store %arg9[%c8, %c17_52], %76 {strides = array<i32>} : memref<16x290xf32, #tpu.memory_space<vmem>>, vector<8x256xf32>,
    %c0_53 = arith.constant 0 : index
    %c0_54 = arith.constant 0 : index
    %78 = vector.load %arg9[%c0_53, %c0_54] : memref<16x290xf32, #tpu.memory_space<vmem>>, vector<16x256xf32>
    %79 = vector.broadcast %6 : vector<1x256xf32> to vector<16x256xf32>
    %80 = arith.mulf %78, %79 : vector<16x256xf32>
    %81 = arith.truncf %80 : vector<16x256xf32> to vector<16x256xbf16>
    %c0_55 = arith.constant 0 : index
    %c0_56 = arith.constant 0 : index
    %82 = vector.load %arg10[%c0_55, %c0_56] : memref<144x256xbf16, #tpu.memory_space<vmem>>, vector<16x256xbf16>
    tpu.vector_store %arg10[%c0_55, %c0_56], %81 {strides = array<i32>} : memref<144x256xbf16, #tpu.memory_space<vmem>>, vector<16x256xbf16>,
    %c0_57 = arith.constant 0 : index
    %c1_58 = arith.constant 1 : index
    %83 = vector.load %arg9[%c0_57, %c1_58] : memref<16x290xf32, #tpu.memory_space<vmem>>, vector<16x256xf32>
    %84 = arith.truncf %83 : vector<16x256xf32> to vector<16x256xbf16>
    %c16_59 = arith.constant 16 : index
    %c0_60 = arith.constant 0 : index
    %85 = vector.load %arg10[%c16_59, %c0_60] : memref<144x256xbf16, #tpu.memory_space<vmem>>, vector<16x256xbf16>
    tpu.vector_store %arg10[%c16_59, %c0_60], %84 {strides = array<i32>} : memref<144x256xbf16, #tpu.memory_space<vmem>>, vector<16x256xbf16>,
    %c0_61 = arith.constant 0 : index
    %c2_62 = arith.constant 2 : index
    %86 = vector.load %arg9[%c0_61, %c2_62] : memref<16x290xf32, #tpu.memory_space<vmem>>, vector<16x256xf32>
    %87 = vector.broadcast %10 : vector<1x256xf32> to vector<16x256xf32>
    %88 = arith.mulf %86, %87 : vector<16x256xf32>
    %89 = arith.truncf %88 : vector<16x256xf32> to vector<16x256xbf16>
    %c32_63 = arith.constant 32 : index
    %c0_64 = arith.constant 0 : index
    %90 = vector.load %arg10[%c32_63, %c0_64] : memref<144x256xbf16, #tpu.memory_space<vmem>>, vector<16x256xbf16>
    tpu.vector_store %arg10[%c32_63, %c0_64], %89 {strides = array<i32>} : memref<144x256xbf16, #tpu.memory_space<vmem>>, vector<16x256xbf16>,
    %c0_65 = arith.constant 0 : index
    %c16_66 = arith.constant 16 : index
    %91 = vector.load %arg9[%c0_65, %c16_66] : memref<16x290xf32, #tpu.memory_space<vmem>>, vector<16x256xf32>
    %92 = vector.broadcast %6 : vector<1x256xf32> to vector<16x256xf32>
    %93 = arith.mulf %91, %92 : vector<16x256xf32>
    %94 = arith.truncf %93 : vector<16x256xf32> to vector<16x256xbf16>
    %c48_67 = arith.constant 48 : index
    %c0_68 = arith.constant 0 : index
    %95 = vector.load %arg10[%c48_67, %c0_68] : memref<144x256xbf16, #tpu.memory_space<vmem>>, vector<16x256xbf16>
    tpu.vector_store %arg10[%c48_67, %c0_68], %94 {strides = array<i32>} : memref<144x256xbf16, #tpu.memory_space<vmem>>, vector<16x256xbf16>,
    %c0_69 = arith.constant 0 : index
    %c17_70 = arith.constant 17 : index
    %96 = vector.load %arg9[%c0_69, %c17_70] : memref<16x290xf32, #tpu.memory_space<vmem>>, vector<16x256xf32>
    %97 = arith.truncf %96 : vector<16x256xf32> to vector<16x256xbf16>
    %c64_71 = arith.constant 64 : index
    %c0_72 = arith.constant 0 : index
    %98 = vector.load %arg10[%c64_71, %c0_72] : memref<144x256xbf16, #tpu.memory_space<vmem>>, vector<16x256xbf16>
    tpu.vector_store %arg10[%c64_71, %c0_72], %97 {strides = array<i32>} : memref<144x256xbf16, #tpu.memory_space<vmem>>, vector<16x256xbf16>,
    %c0_73 = arith.constant 0 : index
    %c18_74 = arith.constant 18 : index
    %99 = vector.load %arg9[%c0_73, %c18_74] : memref<16x290xf32, #tpu.memory_space<vmem>>, vector<16x256xf32>
    %100 = vector.broadcast %10 : vector<1x256xf32> to vector<16x256xf32>
    %101 = arith.mulf %99, %100 : vector<16x256xf32>
    %102 = arith.truncf %101 : vector<16x256xf32> to vector<16x256xbf16>
    %c80_75 = arith.constant 80 : index
    %c0_76 = arith.constant 0 : index
    %103 = vector.load %arg10[%c80_75, %c0_76] : memref<144x256xbf16, #tpu.memory_space<vmem>>, vector<16x256xbf16>
    tpu.vector_store %arg10[%c80_75, %c0_76], %102 {strides = array<i32>} : memref<144x256xbf16, #tpu.memory_space<vmem>>, vector<16x256xbf16>,
    %c0_77 = arith.constant 0 : index
    %c32_78 = arith.constant 32 : index
    %104 = vector.load %arg9[%c0_77, %c32_78] : memref<16x290xf32, #tpu.memory_space<vmem>>, vector<16x256xf32>
    %105 = vector.broadcast %6 : vector<1x256xf32> to vector<16x256xf32>
    %106 = arith.mulf %104, %105 : vector<16x256xf32>
    %107 = arith.truncf %106 : vector<16x256xf32> to vector<16x256xbf16>
    %c96_79 = arith.constant 96 : index
    %c0_80 = arith.constant 0 : index
    %108 = vector.load %arg10[%c96_79, %c0_80] : memref<144x256xbf16, #tpu.memory_space<vmem>>, vector<16x256xbf16>
    tpu.vector_store %arg10[%c96_79, %c0_80], %107 {strides = array<i32>} : memref<144x256xbf16, #tpu.memory_space<vmem>>, vector<16x256xbf16>,
    %c0_81 = arith.constant 0 : index
    %c33_82 = arith.constant 33 : index
    %109 = vector.load %arg9[%c0_81, %c33_82] : memref<16x290xf32, #tpu.memory_space<vmem>>, vector<16x256xf32>
    %110 = arith.truncf %109 : vector<16x256xf32> to vector<16x256xbf16>
    %c112_83 = arith.constant 112 : index
    %c0_84 = arith.constant 0 : index
    %111 = vector.load %arg10[%c112_83, %c0_84] : memref<144x256xbf16, #tpu.memory_space<vmem>>, vector<16x256xbf16>
    tpu.vector_store %arg10[%c112_83, %c0_84], %110 {strides = array<i32>} : memref<144x256xbf16, #tpu.memory_space<vmem>>, vector<16x256xbf16>,
    %c0_85 = arith.constant 0 : index
    %c34_86 = arith.constant 34 : index
    %112 = vector.load %arg9[%c0_85, %c34_86] : memref<16x290xf32, #tpu.memory_space<vmem>>, vector<16x256xf32>
    %113 = vector.broadcast %10 : vector<1x256xf32> to vector<16x256xf32>
    %114 = arith.mulf %112, %113 : vector<16x256xf32>
    %115 = arith.truncf %114 : vector<16x256xf32> to vector<16x256xbf16>
    %c128_87 = arith.constant 128 : index
    %c0_88 = arith.constant 0 : index
    %116 = vector.load %arg10[%c128_87, %c0_88] : memref<144x256xbf16, #tpu.memory_space<vmem>>, vector<16x256xbf16>
    tpu.vector_store %arg10[%c128_87, %c0_88], %115 {strides = array<i32>} : memref<144x256xbf16, #tpu.memory_space<vmem>>, vector<16x256xbf16>,
    %c0_89 = arith.constant 0 : index
    %c0_90 = arith.constant 0 : index
    %117 = vector.load %arg10[%c0_89, %c0_90] : memref<144x256xbf16, #tpu.memory_space<vmem>>, vector<144x256xbf16>
    %c0_91 = arith.constant 0 : index
    %c0_92 = arith.constant 0 : index
    %118 = vector.load %arg4[%c0_91, %c0_92] : memref<8x144xbf16, #tpu.memory_space<vmem>>, vector<8x144xbf16>
    %cst_93 = arith.constant dense<0.000000e+00> : vector<8x256xf32>
    %119 = tpu.matmul %118, %117, %cst_93 {dimension_numbers = #tpu.dot_dimension_numbers<[1], [0], [0], [1], [0, 0, 1, 1], [], []>} : vector<8x144xbf16>, vector<144x256xbf16>, vector<8x256xf32> -> vector<8x256xf32>
    %c0_94 = arith.constant 0 : index
    %c0_95 = arith.constant 0 : index
    %120 = vector.load %arg5[%c0_94, %c0_95] : memref<8x1xf32, #tpu.memory_space<vmem>>, vector<8x1xf32>
    %121 = vector.broadcast %120 : vector<8x1xf32> to vector<8x256xf32>
    %122 = arith.addf %119, %121 : vector<8x256xf32>
    %123 = arith.addf %64, %122 : vector<8x256xf32>
    %c0_96 = arith.constant 0 : index
    %c0_97 = arith.constant 0 : index
    %c0_98 = arith.constant 0 : index
    %124 = vector.load %arg8[%c0_96, %c0_97, %c0_98] : memref<1x8x256xf32, #tpu.memory_space<vmem>>, vector<1x8x256xf32>
    %125 = vector.shape_cast %124 : vector<1x8x256xf32> to vector<8x256xf32>
    %126 = vector.shape_cast %123 : vector<8x256xf32> to vector<1x8x256xf32>
    tpu.vector_store %arg8[%c0_96, %c0_97, %c0_98], %126 {strides = array<i32>} : memref<1x8x256xf32, #tpu.memory_space<vmem>>, vector<1x8x256xf32>,
    return
  }
  func.func @transform_0(%arg0: i32) -> (i32, i32, i32) {
    %c0_i32 = arith.constant 0 : i32
    %c0_i32_0 = arith.constant 0 : i32
    %c0_i32_1 = arith.constant 0 : i32
    return %arg0, %c0_i32, %c0_i32_0 : i32, i32, i32
  }
  func.func @transform_1(%arg0: i32) -> (i32, i32) {
    %c0_i32 = arith.constant 0 : i32
    %c0_i32_0 = arith.constant 0 : i32
    %c0_i32_1 = arith.constant 0 : i32
    return %c0_i32, %c0_i32_0 : i32, i32
  }
  func.func @transform_2(%arg0: i32) -> (i32, i32) {
    %c0_i32 = arith.constant 0 : i32
    %c0_i32_0 = arith.constant 0 : i32
    %c0_i32_1 = arith.constant 0 : i32
    return %c0_i32, %c0_i32_0 : i32, i32
  }
  func.func @transform_3(%arg0: i32) -> (i32, i32) {
    %c0_i32 = arith.constant 0 : i32
    %c0_i32_0 = arith.constant 0 : i32
    %c0_i32_1 = arith.constant 0 : i32
    return %c0_i32, %c0_i32_0 : i32, i32
  }
  func.func @transform_4(%arg0: i32) -> (i32, i32) {
    %c0_i32 = arith.constant 0 : i32
    %c0_i32_0 = arith.constant 0 : i32
    %c0_i32_1 = arith.constant 0 : i32
    return %c0_i32, %c0_i32_0 : i32, i32
  }
  func.func @transform_5(%arg0: i32) -> (i32, i32) {
    %c0_i32 = arith.constant 0 : i32
    %c0_i32_0 = arith.constant 0 : i32
    %c0_i32_1 = arith.constant 0 : i32
    return %c0_i32, %c0_i32_0 : i32, i32
  }
  func.func @transform_6(%arg0: i32) -> (i32, i32) {
    %c0_i32 = arith.constant 0 : i32
    %c0_i32_0 = arith.constant 0 : i32
    %c0_i32_1 = arith.constant 0 : i32
    return %c0_i32, %c0_i32_0 : i32, i32
  }
  func.func @transform_7(%arg0: i32) -> (i32, i32, i32) {
    %c0_i32 = arith.constant 0 : i32
    %c0_i32_0 = arith.constant 0 : i32
    %c0_i32_1 = arith.constant 0 : i32
    return %arg0, %c0_i32, %c0_i32_0 : i32, i32, i32
  }
}

</mosaic_0001>

<bundles_post_ra>
// kernel: tpu_custom_call.1
= control target key start
LH: loop header
LB: loop body
LE: loop exit
PB: predicated region body
PF: predicated region fallthrough
CT: control target
= control target key end

     0   :  { %12 = vsyncpa [#allocation5], 0  ;;  %s1921_s0 = inlined_call_operand.vmem [shape: f32[2,4,256], index: 0, kind: input, shape index: {}]   ;;  %s1922_s1 = inlined_call_operand.vmem [shape: bf16[8,144], index: 1, kind: input, shape index: {}]   ;;  %s1923_s2 = inlined_call_operand.vmem [shape: f32[8,1], index: 2, kind: input, shape index: {}]   ;;  %s1924_s3 = inlined_call_operand.vmem [shape: bf16[8,144], index: 3, kind: input, shape index: {}]   ;;  %s1925_s4 = inlined_call_operand.vmem [shape: f32[8,1], index: 4, kind: input, shape index: {}]   ;;  %s1926_s5 = inlined_call_operand.vmem [shape: bf16[8,144], index: 5, kind: input, shape index: {}]   ;;  %s1927_s6 = inlined_call_operand.vmem [shape: f32[8,1], index: 6, kind: input, shape index: {}]   ;;  %s1928_s7 = inlined_call_operand.hbm [shape: f32[2,8,256], index: 7, kind: output, shape index: {}]  }
   0x1   :  { %14 = vsyncpa [#allocation5 + $0x1], 0  ;;  %s1417_s24 = smov 0   ;;  %s1419_s25 = smov 0  }
   0x2   :  { %s1421_s26 = smov 0   ;;  %s1423_s27 = smov 0  }
   0x3 LB: > { %s1438_s28 = sadd.s32 4294967295, %s1358_s27   ;;  %s1172_s29 = sadd.s32 4294967294, %s1358_s27   ;;  %s1358_s27 = sphi %s1423_s27, %s1934_s27   ;;  %s1354_s26 = sphi %s1421_s26, %s1933_s26   ;;  %s1350_s25 = sphi %s1419_s25, %s1932_s25   ;;  %s1346_s24 = sphi %s1417_s24, %s1931_s24  }
   0x4   : > { %s1442_s30 = sadd.s32 1, %s1358_s27   ;;  %s179_s8 = sadd.s32 1, %s1354_s26 }
   0x5   : > { %s176_s9 = ssub.s32 %s1358_s27, %s1442_s30  ;;  %p189_p0 = scmp.ne.s32.totalorder %s1354_s26, %s1350_s25 }
   0x6   : > { %p177_p1 = scmp.eq.s32.totalorder %s176_s9, 0  ;;  %p190_p2 = scmp.eq.s32.totalorder %s1438_s28, 1 }
   0x7   : > { %p195_p3 = scmp.ne.s32.totalorder %s1350_s25, %s1346_s24  ;;  %p196_p4 = scmp.eq.s32.totalorder %s1172_s29, 1 }
   0x8   : > { %s1453_s10 = scalar_select %p177_p1, %s1354_s26, %s179_s8  }
   0x9   : > { %p1455_p5 = por %p190_p2, %p189_p0  ;;  %p1459_p6 = por %p196_p4, %p195_p3 }
   0xa   : > { %p1175_p7 = scmp.ge.s32.totalorder %s1358_s27, 1  ;;  %p240_p8 = scmp.lt.s32.totalorder %s1358_s27, 3 }
   0xc   : > { %p241_p9 = pnand %p1175_p7, %p240_p8 }
   0xd   : > { %p272_p10 = scmp.lt.s32.totalorder (!%p241_p9), %s1438_s28, 1  ;;  %v278_v0 = vlaneseq (!%p241_p9)  ;;  %vm295_vm0 = vcmask (!%p241_p9), 138240   ;;  %v1360_v1 = vmov (!%p241_p9), 0.0   ;;  %vm317_vm1 = vcmask (!%p241_p9), 1047692   ;;  %s1361_s18 = smov (!%p241_p9), 17  }
   0xe   : > { %244 = sbr.rel (%p241_p9) target bundleno = 1054 (0x41e), region = 48  ;;  %319 = vst [vmem:[#allocation2 + $0x8] sm:$0xf0] (!%p241_p9), %v1360_v1  ;;  %296 = vst.msk [vmem:[#allocation2] sm:$0xff] (!%p241_p9), %vm295_vm0, %v1360_v1  ;;  %vm322_vm2 = vcmask (!%p241_p9), 1047688   ;;  %vm298_vm3 = vcmask (!%p241_p9), 277640  }
   0xf   : > { %297 = vst.msk [vmem:[#allocation2 + $0x18] sm:$0xff] (!%p241_p9), %vm295_vm0, %v1360_v1  ;;  %v279_v2 = vand.u32 (!%p241_p9), 127, %v278_v0  ;;  %vm320_vm4 = vcmask (!%p241_p9), 138244   ;;  %v1362_v9 = vmov (!%p241_p9), 0   ;;  %s1363_s19 = smov (!%p241_p9), 2   ;;  %s1364_s20 = smov (!%p241_p9), 18  }
  0x10   : > { %318 = vst.msk [vmem:[#allocation2] sm:$0xf0] (!%p241_p9), %vm317_vm1, %v1360_v1  ;;  %1287 = vset.pattern.permute.xlu1 (!%p241_p9), %v1362_v9  ;;  %1288 = vset.pattern.permute.xlu0 (!%p241_p9), %v1362_v9  ;;  %s1365_s21 = smov (!%p241_p9), 16   ;;  %s1366_s22 = smov (!%p241_p9), 34   ;;  %vm312_vm9 = vcmask (!%p241_p9), 1043592   ;;  %vm315_vm10 = vcmask (!%p241_p9), 134144  }
  0x11   : > { %323 = vst.msk [vmem:[#allocation2 + $0x18] sm:$0xff] (!%p241_p9), %vm322_vm2, %v1360_v1  ;;  %v280_v3 = vadd.s32 (!%p241_p9), 128, %v279_v2  ;;  %v281_v4 = vand.u32 (!%p241_p9), 15, %v279_v2  ;;  %s1367_s23 = smov (!%p241_p9), 32   ;;  %s1368_s29 = smov (!%p241_p9), 127   ;;  %vm375_vm11 = vcmask (!%p241_p9), 15360  }
  0x12   : > { %299 = vst.msk [vmem:[#allocation2 + $0x10] sm:$0xff] (!%p241_p9), %vm298_vm3, %v1360_v1  ;;  %300 = vst.msk [vmem:[#allocation2 + $0x28] sm:$0xff] (!%p241_p9), %vm298_vm3, %v1360_v1  ;;  %s1369_s8 = smov (!%p241_p9), 112   ;;  %s1370_s9 = smov (!%p241_p9), 126   ;;  %vm417_vm12 = vcmask (!%p241_p9), 130048   ;;  %vm482_vm13 = vcmask (!%p241_p9), 146432  }
  0x13   : > { %321 = vst.msk [vmem:[#allocation2 + $0x10] sm:$0xf0] (!%p241_p9), %vm320_vm4, %v1360_v1  ;;  %v282_v6 = vand.u32 (!%p241_p9), 15, %v280_v3  ;;  %vm283_vm5 = vcmp.ne.s32.totalorder (!%p241_p9), %v281_v4, 0  ;;  %vm289_vm6 = vcmp.ne.s32.totalorder (!%p241_p9), %v281_v4, 15  ;;  %vm522_vm14 = vcmask (!%p241_p9), 261120  }
  0x14   : > { %325 = vst.msk [vmem:[#allocation2 + $0x28] sm:$0xff] (!%p241_p9), %vm295_vm0, %v1360_v1  ;;  %v1181_v8 = vsel (!%p241_p9), %vm289_vm6, 1.0, %v1360_v1  ;;  %v1488_v10 = vsel (!%p241_p9), %vm283_vm5, 1.0, %v1360_v1  ;;  %s1373_s15 = smov (!%p241_p9), 96   ;;  %vm587_vm15 = vcmask (!%p241_p9), 277504   ;;  %s1374_s16 = smov (!%p241_p9), 95  }
  0x15   : > { %s273_s13 = scalar_select %p272_p10, %s1438_s28, 1  ;;  %vm290_vm7 = vcmp.ne.s32.totalorder %v282_v6, 15  ;;  %vm284_vm8 = vcmp.ne.s32.totalorder %v282_v6, 0  ;;  %vm356_vm1 = vcmask 1039360   ;;  %vm398_vm3 = vcmask 1031168  }
  0x16   : > { %v1182_v11 = vsel %vm290_vm7, 1.0, %v1360_v1  ;;  %v1492_v12 = vsel %vm284_vm8, 1.0, %v1360_v1  ;;  %vm440_vm4 = vcmask 916480   ;;  %vm465_vm5 = vcmask 908288  }
  0x17   : > { %s1197_s14 = sshll.u32 %s273_s13, 3  ;;  %v1262_v14 = vpack.i.bf16 %v1182_v11, %v1181_v8  ;;  %v1267_v16 = vpack.i.bf16 %v1492_v12, %v1488_v10  ;;  %v1529_v31 = vmul.f32 0.0, %v1492_v12  ;;  %s1371_s13 = smov 111   ;;  %vm505_vm6 = vcmask 900096  }
  0x18   : > { %s276_s17 = scalar_lea.vmem %s1921_s0, %s1197_s14  ;;  %v1494_v13 = vld [vmem:[#allocation2 + $0x18] sm:$0xff]  ;;  %s1372_s14 = smov 110   ;;  %vm545_vm7 = vcmask 785408   ;;  %vm570_vm8 = vcmask 777216  }
  0x19   : > { %v301_v5 = vld [vmem:[%s276_s17] sm:$0xff]  ;;  %782 = vst.msk [vmem:[#allocation2 + $0x18] sm:$0xff] %vm322_vm2, %v1360_v1  ;;  %1263 = vrot.lane.b32.xlu1 %v1262_v14, %s1363_s19  ;;  %v332_v27 = vmul.f32 %v1488_v10, %v1494_v13  ;;  %s1198_s19 = sshll.u32 %s1438_s28, 8 }
  0x1a   : > { %304 = vrot.lane.b32.xlu0 %v301_v5, %s1361_s18  ;;  %v303_v7 = vcombine.high %v301_v5, %v301_v5  ;;  %s1879_s17 = scalar_lea.hbm %s1928_s7, %s1198_s19 }
  0x1b   : > { %v1496_v15 = vld [vmem:[#allocation2 + $0x28] sm:$0xff] }
  0x1c   : > { %784 = vst.msk [vmem:[#allocation2 + $0x28] sm:$0xff] %vm295_vm0, %v1360_v1 }
  0x1d   : > { %1268 = vrot.lane.b32.xlu1 %v1267_v16, %s1365_s21 }
  0x1e   : > { %306 = vrot.lane.b32.xlu0 %v303_v7, %s1361_s18 }
  0x21   : > { %1278 = vrot.lane.b32.xlu1 %v1267_v16, %s1367_s23 }
  0x22   : > { %1273 = vrot.lane.b32.xlu0 %v1262_v14, %s1364_s20  ;;  %s1375_s20 = smov 94  }
  0x26   : > { %1283 = vrot.lane.b32.xlu0 %v1262_v14, %s1366_s22 }
  0x8b   : > { %v1264_v20 = vpop.permute.xlu1 %1263 }
  0x8c   : > { %v305_v17 = vpop.permute.xlu0 %304  ;;  %v1508_v22 = vunpack.i.l.bf16 %v1264_v20  ;;  %v1552_v45 = vunpack.i.h.bf16 %v1264_v20 }
  0x8d   : > { %313 = vst.msk [vmem:[#allocation2] sm:$0xf] %vm312_vm9, %v305_v17  ;;  %vm610_vm9 = vcmask 769024  }
  0x8e   : > { %v383_v35 = vmul.f32 %v1508_v22, %v1494_v13  ;;  %v385_v51 = vmul.f32 %v1552_v45, %v1496_v15  ;;  %v1576_v52 = vsel %vm375_vm11, %v1508_v22, %v1552_v45 }
  0x8f   : > { %v1269_v23 = vpop.permute.xlu1 %1268  ;;  %v1586_v59 = vmul.f32 0.0, %v1576_v52 }
  0x90   : > { %v307_v18 = vpop.permute.xlu0 %306  ;;  %v1514_v25 = vunpack.i.l.bf16 %v1269_v23  ;;  %v1547_v40 = vunpack.i.h.bf16 %v1269_v23 }
  0x91   : > { %v308_v19 = vsel %vm295_vm0, %v305_v17, %v307_v18  ;;  %316 = vst.msk [vmem:[#allocation2 + $0x10] sm:$0xf] %vm315_vm10, %v307_v18 }
  0x92   : > { %314 = vst [vmem:[#allocation2 + $0x8] sm:$0xf] %v308_v19  ;;  %v425_v30 = vmul.f32 %v1514_v25, %v1494_v13  ;;  %v427_v48 = vmul.f32 %v1547_v40, %v1496_v15  ;;  %v1591_v60 = vsel %vm417_vm12, %v1514_v25, %v1547_v40 }
  0x93   : > { %v1279_v58 = vpop.permute.xlu1 %1278  ;;  %v1602_v3 = vmul.f32 0.0, %v1591_v60 }
  0x94   : > { %v1506_v21 = vld [vmem:[#allocation2] sm:$0xff]  ;;  %v1274_v43 = vpop.permute.xlu0 %1273  ;;  %v1597_v63 = vunpack.i.h.bf16 %v1279_v58  ;;  %v1606_v4 = vunpack.i.l.bf16 %v1279_v58 }
  0x95   : > { %v1512_v24 = vpack.c.bf16 %v1494_v13, %v1506_v21  ;;  %v330_v26 = vmul.f32 %v1488_v10, %v1506_v21  ;;  %v422_v29 = vmul.f32 %v1514_v25, %v1506_v21  ;;  %v380_v34 = vmul.f32 %v1508_v22, %v1506_v21 }
  0x96   : > { %v1564_v49 = vunpack.i.l.bf16 %v1274_v43  ;;  %v1594_v61 = vunpack.i.h.bf16 %v1274_v43  ;;  %v532_v11 = vmul.f32 %v1597_v63, %v1496_v15  ;;  %v527_v17 = vmul.f32 %v1606_v4, %v1506_v21  ;;  %v1667_v43 = vld [vmem:[%s1922_s1] sm:$0xff] }
  0x97   : > { %350 = vrot.lane.b32.xlu1 %v1512_v24, %s1368_s29  ;;  %v428_v36 = vpack.c.bf16 %v425_v30, %v422_v29  ;;  %v334_v38 = vpack.c.bf16 %v332_v27, %v330_v26  ;;  %v386_v41 = vpack.c.bf16 %v383_v35, %v380_v34  ;;  %v530_v18 = vmul.f32 %v1606_v4, %v1494_v13 }
  0x98   : > { %v1522_v28 = vld [vmem:[#allocation2 + $0x10] sm:$0xff]  ;;  %v487_v56 = vmul.f32 %v1564_v49, %v1506_v21  ;;  %v490_v57 = vmul.f32 %v1564_v49, %v1494_v13  ;;  %v492_v6 = vmul.f32 %v1594_v61, %v1496_v15  ;;  %v1621_v14 = vsel %vm482_vm13, %v1564_v49, %v1594_v61  ;;  %v1284_v27 = vpop.permute.xlu0 %1283 }
  0x99   : > { %v1533_v32 = vpack.c.bf16 %v1496_v15, %v1522_v28  ;;  %v1535_v33 = vld [vmem:[#allocation2 + $0x8] sm:$0xff]  ;;  %v692_v44 = vmax.bf16 %v1362_v9, %v334_v38  ;;  %v424_v47 = vmul.f32 %v1547_v40, %v1522_v28  ;;  %v382_v50 = vmul.f32 %v1552_v45, %v1522_v28 }
  0x9a   : > { %v331_v37 = vmul.f32 %v1492_v12, %v1535_v33  ;;  %v1558_v46 = vpack.c.bf16 %v1360_v1, %v1535_v33  ;;  %v381_v54 = vmul.f32 %v1576_v52, %v1535_v33  ;;  %v493_v0 = vpack.c.bf16 %v490_v57, %v487_v56 }
  0x9b   : > { %354 = vrot.lane.b32.xlu0 %v1533_v32, %s1368_s29  ;;  %434 = vrot.lane.b32.xlu1 %v428_v36, %s1369_s8  ;;  %v430_v53 = vpack.c.bf16 %v427_v48, %v424_v47  ;;  %v388_v55 = vpack.c.bf16 %v385_v51, %v382_v50  ;;  %v423_v2 = vmul.f32 %v1591_v60, %v1535_v33  ;;  %v1631_v23 = vmul.f32 0.0, %v1621_v14 }
  0x9c   : > { %v335_v39 = vpack.c.bf16 %v1529_v31, %v331_v37  ;;  %v387_v62 = vpack.c.bf16 %v1586_v59, %v381_v54  ;;  %v489_v5 = vmul.f32 %v1594_v61, %v1522_v28  ;;  %v529_v8 = vmul.f32 %v1597_v63, %v1522_v28 }
  0x9d   : > { %v429_v7 = vpack.c.bf16 %v1602_v3, %v423_v2  ;;  %v488_v20 = vmul.f32 %v1621_v14, %v1535_v33  ;;  %v1635_v26 = vsel %vm522_vm14, %v1606_v4, %v1597_v63  ;;  %v533_v29 = vpack.c.bf16 %v530_v18, %v527_v17 }
  0x9e   : > { %651 = vmatprep.subr.bf16.mxu0 %v335_v39  ;;  %v693_v42 = vmax.bf16 %v1362_v9, %v335_v39  ;;  %v495_v16 = vpack.c.bf16 %v492_v6, %v489_v5  ;;  %v535_v19 = vpack.c.bf16 %v532_v11, %v529_v8  ;;  %v528_v30 = vmul.f32 %v1635_v26, %v1535_v33 }
  0x9f   : > { %392 = vrot.lane.b32.xlu0 %v386_v41, %s1370_s9  ;;  %652 = vmatpush1.bf16.msra.mxu0 %v334_v38  ;;  %v1642_v34 = vmul.f32 0.0, %v1635_v26  ;;  %v1644_v35 = vunpack.i.h.bf16 %v1284_v27  ;;  %v1646_v36 = vunpack.i.l.bf16 %v1284_v27  ;;  %v494_v37 = vpack.c.bf16 %v1631_v23, %v488_v20 }
  0xa0   : > { %463 = vrot.lane.b32.xlu1 %v1533_v32, %s1371_s13  ;;  %726 = vmatprep.subr.bf16.mxu1 %v693_v42 }
  0xa1   : > { %727 = vmatpush1.bf16.msra.mxu1 %v692_v44  ;;  %v534_v38 = vpack.c.bf16 %v1642_v34, %v528_v30  ;;  %v1654_v39 = vsel %vm587_vm15, %v1646_v36, %v1644_v35  ;;  %v594_v44 = vmul.f32 %v1644_v35, %v1522_v28  ;;  %v597_v47 = vmul.f32 %v1644_v35, %v1496_v15 }
  0xa2   : > { %v593_v41 = vmul.f32 %v1654_v39, %v1535_v33  ;;  %v1662_v42 = vmul.f32 0.0, %v1654_v39  ;;  %v592_v48 = vmul.f32 %v1646_v36, %v1506_v21  ;;  %v595_v28 = vmul.f32 %v1646_v36, %v1494_v13 }
  0xa3   : > { %461 = vrot.lane.b32.xlu0 %v1558_v46, %s1371_s13  ;;  %v600_v15 = vpack.c.bf16 %v597_v47, %v594_v44 }
  0xa4   : > { %352 = vrot.lane.b32.xlu1 %v1558_v46, %s1368_s29  ;;  %v599_v33 = vpack.c.bf16 %v1662_v42, %v593_v41 }
  0xa7   : > { %438 = vrot.lane.b32.xlu0 %v430_v53, %s1369_s8 }
  0xa8   : > { %396 = vrot.lane.b32.xlu1 %v388_v55, %s1370_s9 }
  0xab   : > { %394 = vrot.lane.b32.xlu0 %v387_v62, %s1370_s9 }
  0xac   : > { %499 = vrot.lane.b32.xlu1 %v493_v0, %s1372_s14 }
  0xaf   : > { %459 = vrot.lane.b32.xlu0 %v1512_v24, %s1371_s13 }
  0xb0   : > { %436 = vrot.lane.b32.xlu1 %v429_v7, %s1369_s8 }
  0xb3   : > { %503 = vrot.lane.b32.xlu0 %v495_v16, %s1372_s14 }
  0xb4   : > { %543 = vrot.lane.b32.xlu1 %v535_v19, %s1373_s15 }
  0xb7   : > { %539 = vrot.lane.b32.xlu0 %v533_v29, %s1373_s15 }
  0xb8   : > { %501 = vrot.lane.b32.xlu1 %v494_v37, %s1372_s14 }
  0xbb   : > { %541 = vrot.lane.b32.xlu0 %v534_v38, %s1373_s15 }
  0xbc   : > { %566 = vrot.lane.b32.xlu1 %v1558_v46, %s1374_s16  ;;  %v1187_v46 = vcombine.high %v1667_v43, %v1667_v43 }
  0xbe   : > { %1188 = vmatprep.mubr.msk.bf16.mxu1 %vm417_vm12, %v1187_v46 }
  0xbf   : > { %568 = vrot.lane.b32.xlu0 %v1533_v32, %s1374_s16  ;;  %v598_v32 = vpack.c.bf16 %v595_v28, %v592_v48 }
  0xc0   : > { %564 = vrot.lane.b32.xlu1 %v1512_v24, %s1374_s16  ;;  %v711_v24 = vld [vmem:[%s1923_s2] sm:$0xff] }
  0xc3   : > { %606 = vrot.lane.b32.xlu0 %v599_v33, %s1375_s20 }
  0xc4   : > { %608 = vrot.lane.b32.xlu1 %v600_v15, %s1375_s20 }
  0xc7   : > { %604 = vrot.lane.b32.xlu0 %v598_v32, %s1375_s20 }
  0xc8   : > { %714 = vperm.xlu1 %1287, %v711_v24  }
 0x109   : > { %v351_v50 = vpop.permute.xlu1 %350 }
 0x10d   : > { %v355_v51 = vpop.permute.xlu0 %354  ;;  %v435_v21 = vpop.permute.xlu1 %434 }
 0x111   : > { %v393_v53 = vpop.permute.xlu0 %392 }
 0x112   : > { %v464_v54 = vpop.permute.xlu1 %463 }
 0x115   : > { %v462_v13 = vpop.permute.xlu0 %461 }
 0x116   : > { %v353_v55 = vpop.permute.xlu1 %352  ;;  %v467_v27 = vsel %vm465_vm5, %v462_v13, %v464_v54 }
 0x117   : > { %v358_v56 = vsel %vm356_vm1, %v353_v55, %v355_v51  ;;  %v357_v57 = vsel %vm356_vm1, %v351_v50, %v353_v55  ;;  %v701_v38 = vmax.bf16 %v1362_v9, %v467_v27 }
 0x118   : > { %653 = vmatprep.subr.bf16.mxu0 %v358_v56  ;;  %v695_v58 = vmax.bf16 %v1362_v9, %v358_v56  ;;  %v694_v62 = vmax.bf16 %v1362_v9, %v357_v57 }
 0x119   : > { %654 = vmatpush1.bf16.msra.mxu0 %v357_v57  ;;  %v439_v0 = vpop.permute.xlu0 %438 }
 0x11a   : > { %v397_v2 = vpop.permute.xlu1 %396  ;;  %728 = vmatprep.subr.bf16.mxu1 %v695_v58 }
 0x11b   : > { %729 = vmatpush1.bf16.msra.mxu1 %v694_v62 }
 0x11d   : > { %v395_v5 = vpop.permute.xlu0 %394 }
 0x11e   : > { %v500_v6 = vpop.permute.xlu1 %499  ;;  %v400_v7 = vsel %vm398_vm3, %v395_v5, %v397_v2  ;;  %v399_v8 = vsel %vm398_vm3, %v393_v53, %v395_v5 }
 0x11f   : > { %655 = vmatprep.subr.bf16.mxu0 %v400_v7  ;;  %v697_v11 = vmax.bf16 %v1362_v9, %v400_v7  ;;  %v696_v16 = vmax.bf16 %v1362_v9, %v399_v8 }
 0x120   : > { %656 = vmatpush1.bf16.msra.mxu0 %v399_v8 }
 0x121   : > { %730 = vmatprep.subr.bf16.mxu1 %v697_v11  ;;  %v460_v17 = vpop.permute.xlu0 %459 }
 0x122   : > { %731 = vmatpush1.bf16.msra.mxu1 %v696_v16  ;;  %v437_v18 = vpop.permute.xlu1 %436  ;;  %v466_v44 = vsel %vm465_vm5, %v460_v17, %v462_v13  ;;  %v1186_v16 = vcombine.low %v1667_v43, %v1667_v43 }
 0x123   : > { %v442_v19 = vsel %vm440_vm4, %v437_v18, %v439_v0  ;;  %v441_v20 = vsel %vm440_vm4, %v435_v21, %v437_v18  ;;  %v700_v46 = vmax.bf16 %v1362_v9, %v466_v44 }
 0x124   : > { %657 = vmatprep.subr.bf16.mxu0 %v442_v19  ;;  %v699_v29 = vmax.bf16 %v1362_v9, %v442_v19  ;;  %v698_v30 = vmax.bf16 %v1362_v9, %v441_v20 }
 0x125   : > { %v504_v37 = vpop.permute.xlu0 %503  ;;  %658 = vmatpush1.bf16.msra.mxu0 %v441_v20 }
 0x126   : > { %659 = vmatprep.subr.bf16.mxu0 %v467_v27  ;;  %732 = vmatprep.subr.bf16.mxu1 %v699_v29  ;;  %v544_v41 = vpop.permute.xlu1 %543 }
 0x127   : > { %733 = vmatpush1.bf16.msra.mxu1 %v698_v30 }
 0x128   : > { %734 = vmatprep.subr.bf16.mxu1 %v701_v38  ;;  %v635_v38 = vld [vmem:[%s1926_s5] sm:$0xff] }
 0x129   : > { %v540_v47 = vpop.permute.xlu0 %539  ;;  %660 = vmatpush1.bf16.msra.mxu0 %v466_v44  ;;  %v1183_v44 = vcombine.low %v635_v38, %v635_v38 }
 0x12a   : > { %v502_v33 = vpop.permute.xlu1 %501 }
 0x12b   : > { %735 = vmatpush1.bf16.msra.mxu1 %v700_v46  ;;  %v507_v48 = vsel %vm505_vm6, %v502_v33, %v504_v37  ;;  %v506_v28 = vsel %vm505_vm6, %v500_v6, %v502_v33 }
 0x12c   : > { %661 = vmatprep.subr.bf16.mxu0 %v507_v48  ;;  %v703_v15 = vmax.bf16 %v1362_v9, %v507_v48  ;;  %v702_v32 = vmax.bf16 %v1362_v9, %v506_v28 }
 0x12d   : > { %v542_v24 = vpop.permute.xlu0 %541  ;;  %662 = vmatpush1.bf16.msra.mxu0 %v506_v28  ;;  %v1740_v28 = vld [vmem:[#allocation2 + $0x18] sm:$0xff] }
 0x12e   : > { %736 = vmatprep.subr.bf16.mxu1 %v703_v15  ;;  %v567_v50 = vpop.permute.xlu1 %566  ;;  %v547_v51 = vsel %vm545_vm7, %v542_v24, %v544_v41  ;;  %v546_v21 = vsel %vm545_vm7, %v540_v47, %v542_v24  ;;  %v791_v15 = vmul.f32 %v1488_v10, %v1740_v28 }
 0x12f   : > { %663 = vmatprep.subr.bf16.mxu0 %v547_v51  ;;  %v705_v53 = vmax.bf16 %v1362_v9, %v547_v51  ;;  %737 = vmatpush1.bf16.msra.mxu1 %v702_v32  ;;  %v704_v13 = vmax.bf16 %v1362_v9, %v546_v21  ;;  %v1752_v51 = vld [vmem:[#allocation2 + $0x28] sm:$0xff] }
 0x131   : > { %v569_v54 = vpop.permute.xlu0 %568  ;;  %664 = vmatpush1.bf16.msra.mxu0 %v546_v21  ;;  %738 = vmatprep.subr.bf16.mxu1 %v705_v53 }
 0x132   : > { %v565_v55 = vpop.permute.xlu1 %564  ;;  %v572_v56 = vsel %vm570_vm8, %v567_v50, %v569_v54  ;;  %v830_v54 = vmul.f32 %v1508_v22, %v1740_v28 }
 0x133   : > { %665 = vmatprep.subr.bf16.mxu0 %v572_v56  ;;  %v707_v57 = vmax.bf16 %v1362_v9, %v572_v56  ;;  %739 = vmatpush1.bf16.msra.mxu1 %v704_v13  ;;  %v571_v58 = vsel %vm570_vm8, %v565_v55, %v567_v50 }
 0x134   : > { %v706_v62 = vmax.bf16 %v1362_v9, %v571_v58 }
 0x135   : > { %v607_v0 = vpop.permute.xlu0 %606  ;;  %666 = vmatpush1.bf16.msra.mxu0 %v571_v58  ;;  %740 = vmatprep.subr.bf16.mxu1 %v707_v57  ;;  %v862_v57 = vmul.f32 %v1547_v40, %v1752_v51 }
 0x136   : > { %v609_v2 = vpop.permute.xlu1 %608 }
 0x137   : > { %741 = vmatpush1.bf16.msra.mxu1 %v706_v62  ;;  %v612_v5 = vsel %vm610_vm9, %v607_v0, %v609_v2  ;;  %v832_v2 = vmul.f32 %v1552_v45, %v1752_v51 }
 0x138   : > { %667 = vmatprep.subr.bf16.mxu0 %v612_v5  ;;  %v709_v6 = vmax.bf16 %v1362_v9, %v612_v5 }
 0x139   : > { %v605_v7 = vpop.permute.xlu0 %604 }
 0x13a   : > { %742 = vmatprep.subr.bf16.mxu1 %v709_v6  ;;  %v611_v8 = vsel %vm610_vm9, %v605_v7, %v607_v0  ;;  %v914_v6 = vmul.f32 %v1564_v49, %v1740_v28 }
 0x13b   : > { %668 = vmatpush1.bf16.msra.mxu0 %v611_v8  ;;  %v708_v11 = vmax.bf16 %v1362_v9, %v611_v8  ;;  %v1184_v9 = vcombine.high %v635_v38, %v635_v38  ;;  %v1038_v38 = vld [vmem:[%s1925_s4] sm:$0xff] }
 0x13d   : > { %743 = vmatpush1.bf16.msra.mxu1 %v708_v11  ;;  %1185 = vmatprep.mubr.msk.bf16.mxu0 %vm417_vm12, %v1184_v9 }
 0x13e   : > { %684 = vmatmul.mubr.bf16.vlgmr.msra.gmra.mrb[0].mxu0 %v1183_v44 }
 0x140   : > { %759 = vmatmul.mubr.bf16.vlgmr.msra.gmra.mrb[0].mxu1 %v1186_v16  ;;  %v946_v16 = vmul.f32 %v1597_v63, %v1752_v51 }
 0x147   : > { %v715_v17 = vpop.permute.xlu1 %714 }
 0x213   : > { %v760_v18 = vpop.f32.mrb[0].mxu1 }
 0x214   : > { %v761_v19 = vadd.f32 %v760_v18, %v715_v17  ;;  %v762_v20 = vpop.f32.mrb[1].mxu1 }
 0x215   : > { %v763_v27 = vadd.f32 %v762_v20, %v715_v17  ;;  %v764_v29 = vpop.f32.mrb[2].mxu1  ;;  %v944_v17 = vmul.f32 %v1606_v4, %v1740_v28 }
 0x216   : > { %v767_v30 = vmax.f32 %v761_v19, 0.0  ;;  %v765_v37 = vpop.f32.mrb[3].mxu1  ;;  %v998_v29 = vmul.f32 %v1646_v36, %v1740_v28 }
 0x217   : > { %v768_v41 = vmax.f32 %v763_v27, 0.0 }
 0x218   : > { %771 = vrot.lane.b32.xlu0 %v767_v30, %s1361_s18 }
 0x219   : > { %773 = vrot.lane.b32.xlu1 %v768_v41, %s1361_s18 }
 0x28a   : > { %v772_v43 = vpop.permute.xlu0 %771 }
 0x28b   : > { %779 = vst.msk [vmem:[#allocation2] sm:$0xff] %vm322_vm2, %v772_v43  ;;  %v774_v47 = vpop.permute.xlu1 %773 }
 0x28c   : > { %v1733_v46 = vsel %vm295_vm0, %v772_v43, %v774_v47  ;;  %781 = vst.msk [vmem:[#allocation2 + $0x10] sm:$0xff] %vm295_vm0, %v774_v47 }
 0x28d   : > { %780 = vst [vmem:[#allocation2 + $0x8] sm:$0xff] %v1733_v46  ;;  %v790_v33 = vmul.f32 %v1492_v12, %v1733_v46  ;;  %v828_v0 = vmul.f32 %v1733_v46, %v1576_v52  ;;  %v858_v7 = vmul.f32 %v1733_v46, %v1591_v60  ;;  %v942_v19 = vmul.f32 %v1733_v46, %v1635_v26 }
 0x28e   : > { %v996_v26 = vmul.f32 %v1733_v46, %v1654_v39  ;;  %v1000_v39 = vmul.f32 %v1644_v35, %v1752_v51 }
 0x28f   : > { %v794_v48 = vpack.c.bf16 %v1529_v31, %v790_v33  ;;  %v864_v8 = vpack.c.bf16 %v1602_v3, %v858_v7  ;;  %v912_v3 = vmul.f32 %v1733_v46, %v1621_v14 }
 0x291   : > { %1053 = vmatprep.subr.bf16.mxu0 %v794_v48  ;;  %v918_v20 = vpack.c.bf16 %v1631_v23, %v912_v3 }
 0x292   : > { %v1744_v32 = vld [vmem:[#allocation2] sm:$0xff] }
 0x293   : > { %v1748_v24 = vpack.c.bf16 %v1740_v28, %v1744_v32  ;;  %v1750_v50 = vld [vmem:[#allocation2 + $0x10] sm:$0xff]  ;;  %v789_v12 = vmul.f32 %v1488_v10, %v1744_v32  ;;  %v827_v21 = vmul.f32 %v1508_v22, %v1744_v32  ;;  %v804_v10 = vpack.c.bf16 %v1360_v1, %v1733_v46 }
 0x294   : > { %v805_v31 = vpack.c.bf16 %v1752_v51, %v1750_v50  ;;  %v857_v55 = vmul.f32 %v1514_v25, %v1744_v32  ;;  %v859_v56 = vmul.f32 %v1547_v40, %v1750_v50  ;;  %v860_v22 = vmul.f32 %v1514_v25, %v1740_v28 }
 0x295   : > { %809 = vrot.lane.b32.xlu0 %v1748_v24, %s1368_s29  ;;  %v793_v53 = vpack.c.bf16 %v791_v15, %v789_v12  ;;  %v833_v13 = vpack.c.bf16 %v830_v54, %v827_v21  ;;  %v829_v1 = vmul.f32 %v1552_v45, %v1750_v50  ;;  %v911_v5 = vmul.f32 %v1564_v49, %v1744_v32 }
 0x296   : > { %813 = vrot.lane.b32.xlu1 %v805_v31, %s1368_s29  ;;  %v863_v58 = vpack.c.bf16 %v860_v22, %v857_v55  ;;  %v865_v62 = vpack.c.bf16 %v862_v57, %v859_v56  ;;  %v834_v40 = vpack.c.bf16 %v1586_v59, %v828_v0  ;;  %v913_v45 = vmul.f32 %v1594_v61, %v1750_v50 }
 0x297   : > { %1054 = vmatpush1.bf16.msra.mxu0 %v793_v53  ;;  %v835_v25 = vpack.c.bf16 %v832_v2, %v829_v1  ;;  %v917_v52 = vpack.c.bf16 %v914_v6, %v911_v5  ;;  %v916_v59 = vmul.f32 %v1594_v61, %v1752_v51  ;;  %v943_v49 = vmul.f32 %v1597_v63, %v1750_v50 }
 0x298   : > { %v941_v60 = vmul.f32 %v1606_v4, %v1744_v32  ;;  %v948_v63 = vpack.c.bf16 %v1642_v34, %v942_v19  ;;  %v1827_v4 = vld [vmem:[%s1924_s3] sm:$0xff]  ;;  %v997_v23 = vmul.f32 %v1644_v35, %v1750_v50  ;;  %v1002_v34 = vpack.c.bf16 %v1662_v42, %v996_v26 }
 0x299   : > { %897 = vrot.lane.b32.xlu0 %v805_v31, %s1371_s13  ;;  %v919_v11 = vpack.c.bf16 %v916_v59, %v913_v45  ;;  %v949_v61 = vpack.c.bf16 %v946_v16, %v943_v49  ;;  %v1190_v14 = vcombine.high %v1827_v4, %v1827_v4  ;;  %v995_v27 = vmul.f32 %v1646_v36, %v1744_v32  ;;  %v636_v42 = vld [vmem:[%s1927_s6] sm:$0xff] }
 0x29a   : > { %839 = vrot.lane.b32.xlu1 %v833_v13, %s1370_s9  ;;  %v947_v18 = vpack.c.bf16 %v944_v17, %v941_v60  ;;  %v1003_v30 = vpack.c.bf16 %v1000_v39, %v997_v23 }
 0x29b   : > { %1191 = vmatprep.mubr.msk.bf16.mxu0 %vm417_vm12, %v1190_v14  ;;  %v1001_v37 = vpack.c.bf16 %v998_v29, %v995_v27 }
 0x29d   : > { %811 = vrot.lane.b32.xlu0 %v804_v10, %s1368_s29  ;;  %s1376_s29 = smov [#allocation4]  }
 0x29e   : > { %895 = vrot.lane.b32.xlu1 %v804_v10, %s1371_s13 }
 0x2a1   : > { %869 = vrot.lane.b32.xlu0 %v863_v58, %s1369_s8 }
 0x2a2   : > { %873 = vrot.lane.b32.xlu1 %v865_v62, %s1369_s8 }
 0x2a5   : > { %843 = vrot.lane.b32.xlu0 %v835_v25, %s1370_s9 }
 0x2a6   : > { %841 = vrot.lane.b32.xlu1 %v834_v40, %s1370_s9 }
 0x2a9   : > { %923 = vrot.lane.b32.xlu0 %v917_v52, %s1372_s14 }
 0x2aa   : > { %893 = vrot.lane.b32.xlu1 %v1748_v24, %s1371_s13 }
 0x2ad   : > { %871 = vrot.lane.b32.xlu0 %v864_v8, %s1369_s8  ;;  %v1189_v8 = vcombine.low %v1827_v4, %v1827_v4  ;;  %s1300_s8 = sshll.u32 %s1376_s29, 4  ;;  %s1301_s8 = int_to_ptr.vmem [resolvable:$false] %s1300_s8 }
 0x2ae   : > { %927 = vrot.lane.b32.xlu1 %v919_v11, %s1372_s14  ;;  %s1302_s9 = scalar_lea.vmem %s1301_s8, 512 }
 0x2b1   : > { %957 = vrot.lane.b32.xlu0 %v949_v61, %s1373_s15 }
 0x2b2   : > { %953 = vrot.lane.b32.xlu1 %v947_v18, %s1373_s15 }
 0x2b5   : > { %925 = vrot.lane.b32.xlu0 %v918_v20, %s1372_s14 }
 0x2b6   : > { %955 = vrot.lane.b32.xlu1 %v948_v63, %s1373_s15  ;;  %s269_s15 = sand.u32 1, %s1350_s25  }
 0x2b7   : > { %s1099_s28 = scalar_lea.sflag [#allocation5], %s269_s15 }
 0x2b9   : > { %979 = vrot.lane.b32.xlu0 %v804_v10, %s1374_s16 }
 0x2ba   : > { %981 = vrot.lane.b32.xlu1 %v805_v31, %s1374_s16 }
 0x2bd   : > { %977 = vrot.lane.b32.xlu0 %v1748_v24, %s1374_s16  ;;  %s1176_s16 = sshll.u32 %s269_s15, 4 }
 0x2be   : > { %1009 = vrot.lane.b32.xlu1 %v1002_v34, %s1375_s20 }
 0x2c1   : > { %1011 = vrot.lane.b32.xlu0 %v1003_v30, %s1375_s20 }
 0x2c2   : > { %1007 = vrot.lane.b32.xlu1 %v1001_v37, %s1375_s20  ;;  %s271_s20 = scalar_lea.vmem [#allocation4], %s1176_s16 }
 0x2c3   : > { %s1113_s21 = sshll.u32 %s271_s20, 4  ;;  %s1881_s21 = int_to_ptr.vmem [resolvable:$true] %s1113_s21 }
 0x2c4   : > { %s1296_s18 = scalar_lea.vmem %s1881_s21, 256  ;;  %p1303_p0 = scmp.lt.s32.totalorder %s1881_s21, %s1301_s8 }
 0x2c5   : > { %639 = vperm.xlu0 %1288, %v636_v42   ;;  %p1297_p11 = scmp.ne.s32.totalorder %s1881_s21, %s1296_s18  ;;  %p1304_p1 = scmp.lt.s32.totalorder %s1302_s9, %s1296_s18 }
 0x2c6   : > { %1041 = vperm.xlu1 %1287, %v1038_v38  }
 0x2c7   : > { %p1298_p12 = pnand %p1297_p11, %p1455_p5  ;;  %p1305_p2 = por %p1304_p1, %p1303_p0 }
 0x2c9   : > { %p1299_p13 = pneg %p1298_p12 }
 0x2cb   : > { %p1306_p3 = pnand %p1305_p2, %p1299_p13 }
 0x307   : > { %v810_v35 = vpop.permute.xlu0 %809 }
 0x308   : > { %v814_v41 = vpop.permute.xlu1 %813 }
 0x30b   : > { %v898_v44 = vpop.permute.xlu0 %897 }
 0x30c   : > { %v840_v36 = vpop.permute.xlu1 %839 }
 0x30f   : > { %v812_v9 = vpop.permute.xlu0 %811 }
 0x310   : > { %v815_v43 = vsel %vm356_vm1, %v810_v35, %v812_v9  ;;  %v896_v47 = vpop.permute.xlu1 %895  ;;  %v816_v46 = vsel %vm356_vm1, %v812_v9, %v814_v41 }
 0x311   : > { %1055 = vmatprep.subr.bf16.mxu0 %v816_v46  ;;  %v900_v54 = vsel %vm465_vm5, %v896_v47, %v898_v44 }
 0x312   : > { %1056 = vmatpush1.bf16.msra.mxu0 %v815_v43 }
 0x313   : > { %v870_v33 = vpop.permute.xlu0 %869 }
 0x314   : > { %v874_v48 = vpop.permute.xlu1 %873 }
 0x317   : > { %v844_v28 = vpop.permute.xlu0 %843 }
 0x318   : > { %v842_v15 = vpop.permute.xlu1 %841 }
 0x319   : > { %v845_v32 = vsel %vm398_vm3, %v840_v36, %v842_v15  ;;  %v846_v24 = vsel %vm398_vm3, %v842_v15, %v844_v28 }
 0x31a   : > { %1057 = vmatprep.subr.bf16.mxu0 %v846_v24 }
 0x31b   : > { %v924_v50 = vpop.permute.xlu0 %923  ;;  %1058 = vmatpush1.bf16.msra.mxu0 %v845_v32 }
 0x31c   : > { %v894_v51 = vpop.permute.xlu1 %893 }
 0x31d   : > { %v899_v55 = vsel %vm465_vm5, %v894_v51, %v896_v47 }
 0x31f   : > { %v872_v12 = vpop.permute.xlu0 %871 }
 0x320   : > { %v875_v31 = vsel %vm440_vm4, %v870_v33, %v872_v12  ;;  %v928_v21 = vpop.permute.xlu1 %927  ;;  %v876_v53 = vsel %vm440_vm4, %v872_v12, %v874_v48 }
 0x321   : > { %1059 = vmatprep.subr.bf16.mxu0 %v876_v53 }
 0x322   : > { %1060 = vmatpush1.bf16.msra.mxu0 %v875_v31 }
 0x323   : > { %v958_v13 = vpop.permute.xlu0 %957  ;;  %1061 = vmatprep.subr.bf16.mxu0 %v900_v54 }
 0x324   : > { %v954_v10 = vpop.permute.xlu1 %953 }
 0x326   : > { %1062 = vmatpush1.bf16.msra.mxu0 %v899_v55 }
 0x327   : > { %v926_v56 = vpop.permute.xlu0 %925 }
 0x328   : > { %v929_v22 = vsel %vm505_vm6, %v924_v50, %v926_v56  ;;  %v956_v57 = vpop.permute.xlu1 %955  ;;  %v930_v58 = vsel %vm505_vm6, %v926_v56, %v928_v21 }
 0x329   : > { %1063 = vmatprep.subr.bf16.mxu0 %v930_v58  ;;  %v960_v1 = vsel %vm545_vm7, %v956_v57, %v958_v13  ;;  %v959_v2 = vsel %vm545_vm7, %v954_v10, %v956_v57 }
 0x32a   : > { %1064 = vmatpush1.bf16.msra.mxu0 %v929_v22 }
 0x32b   : > { %v980_v62 = vpop.permute.xlu0 %979  ;;  %1065 = vmatprep.subr.bf16.mxu0 %v960_v1 }
 0x32c   : > { %v982_v0 = vpop.permute.xlu1 %981 }
 0x32d   : > { %v984_v25 = vsel %vm570_vm8, %v980_v62, %v982_v0 }
 0x32e   : > { %1066 = vmatpush1.bf16.msra.mxu0 %v959_v2 }
 0x32f   : > { %v978_v5 = vpop.permute.xlu0 %977  ;;  %1067 = vmatprep.subr.bf16.mxu0 %v984_v25 }
 0x330   : > { %v983_v40 = vsel %vm570_vm8, %v978_v5, %v980_v62  ;;  %v1010_v6 = vpop.permute.xlu1 %1009 }
 0x332   : > { %1068 = vmatpush1.bf16.msra.mxu0 %v983_v40 }
 0x333   : > { %v1012_v52 = vpop.permute.xlu0 %1011 }
 0x334   : > { %v1008_v7 = vpop.permute.xlu1 %1007  ;;  %v1014_v45 = vsel %vm610_vm9, %v1010_v6, %v1012_v52 }
 0x335   : > { %v1013_v59 = vsel %vm610_vm9, %v1008_v7, %v1010_v6  ;;  %1069 = vmatprep.subr.bf16.mxu0 %v1014_v45 }
 0x336   : > { %1070 = vmatpush1.bf16.msra.mxu0 %v1013_v59 }
 0x339   : > { %1086 = vmatmul.mubr.bf16.vlgmr.msra.gmra.mrb[0].mxu0 %v1189_v8 }
 0x344   : > { %v640_v11 = vpop.permute.xlu0 %639 }
 0x345   : > { %v1042_v49 = vpop.permute.xlu1 %1041 }
 0x346   : > { %v1199_v60 = vadd.f32 %v1042_v49, %v640_v11 }
 0x40c   : > { %v1087_v16 = vpop.f32.mrb[0].mxu0 }
 0x40d   : > { %v1200_v17 = vadd.f32 %v1199_v60, %v1087_v16  ;;  %v1089_v61 = vpop.f32.mrb[1].mxu0 }
 0x40e   : > { %v1202_v3 = vadd.f32 %v1199_v60, %v1089_v61  ;;  %v1091_v18 = vpop.f32.mrb[2].mxu0 }
 0x40f   : > { %1096 = vst [vmem:[%s271_s20] sm:$0xff] %v1200_v17  ;;  %v1092_v19 = vpop.f32.mrb[3].mxu0 }
 0x410   : > { %1097 = vst [vmem:[%s271_s20 + $0x8] sm:$0xff] %v1202_v3 }
 0x411   : > { %1309 = shalt.err (!%p1306_p3)
}
 0x412   : > { %s1310_s13 = scalar_lea.hbm %s1879_s17, 256  ;;  %s1314_s16 = scalar_lea.hbm %s1928_s7, 512 }
 0x413   : > { %p1311_p4 = scmp.ne.s32.totalorder %s1879_s17, %s1310_s13  ;;  %p1315_p9 = scmp.lt.u32.totalorder %s1879_s17, %s1928_s7 }
 0x414   : > { %p1316_p10 = scmp.lt.u32.totalorder %s1314_s16, %s1310_s13  ;;  %p1318_p12 = scmp.lt.u32.totalorder %s1310_s13, %s1879_s17 }
 0x415   : > { %p1312_p7 = pnand %p1311_p4, %p1455_p5 }
 0x416   : > { %p1317_p11 = por %p1316_p10, %p1315_p9 }
 0x417   : > { %p1313_p8 = pneg %p1312_p7 }
 0x418   : > { %p1319_p13 = por %p1318_p12, %p1317_p11 }
 0x41a   : > { %p1320_p0 = pnand %p1319_p13, %p1313_p8 }
 0x41c   : > { %1323 = shalt.err (!%p1320_p0)
}
 0x41d   : > { %1207 = dma.vmem_to_hbm [thread:$0]  (%p1455_p5), %s1881_s21, 256, %s1879_s17, %s1099_s28  }
 0x41e PF: > { %p1213_p1 = scmp.ge.s32.totalorder %s1358_s27, 2  ;;  %s1125_s22 = sand.u32 1, %s1346_s24  }
 0x41f   : > { %s1126_s23 = scalar_lea.sflag [#allocation5], %s1125_s22 }
 0x420   : > { %p1210_p2 = pnand %p1213_p1, %p1459_p6 }
 0x422   : > { %1341 = dma.done.wait (!%p1210_p2), %s1126_s23, 256  }
 0x423   : > { %1343 = vsyncadd (!%p1210_p2), %s1126_s23, 4294967040  ;;  %p17_p3 = scmp.ge.s32.totalorder %s1442_s30, 4   ;;  %s1931_s24 = smov %s1350_s25 }
 0x424   : > { %s1932_s25 = smov %s1354_s26  ;;  %s1933_s26 = smov %s1453_s10 }
 0x425   : > { %s1934_s27 = smov %s1442_s30  ;;  %19 = sbr.rel (!%p17_p3) target bundleno = 3 (0x3), region = 83 }
 0x42c   :  { %1131 = vsyncpa [#allocation5], 1 }
 0x42d   :  { %1133 = vsyncpa [#allocation5 + $0x1], 1 }

</bundles_post_ra>
